<compile_context>
chip_gen: v7x
topology: tpu7x:2x2x1
jax: 0.10.0
libtpu: 0.0.40
codegen_flags: <defaults>
</compile_context>

<pallas_src>
import functools

import jax
import jax.numpy as jnp
import numpy as np
from jax.experimental import pallas as pl
from jax.experimental.pallas import tpu as pltpu


def _round_up(n, m):
    return ((n + m - 1) // m) * m


def fpn_kernel(x_ref, w_ref, b_ref, p_ref, taus_ref, taus_mid_ref, ent_ref):
    t = w_ref.shape[1]

    x = x_ref[...]                       # (bb, D)   f32 or bf16
    w = w_ref[...]                       # (D, T)    same dtype as x
    b = b_ref[...]                       # (1, T)    f32

    # linear layer; broadcast bias add is free (VALU slots have huge slack)
    logits = jnp.dot(x, w, preferred_element_type=jnp.float32) + b   # (bb, T) f32

    # numerically stable log_softmax along dim=1
    m = jnp.max(logits, axis=1, keepdims=True)
    shifted = logits - m
    lse = jnp.log(jnp.sum(jnp.exp(shifted), axis=1, keepdims=True))
    q = shifted - lse                    # log-probs (bb, T)
    q_probs = jnp.exp(q)                 # probs     (bb, T)

    # One tiny constant matmul produces all cumsum-derived columns:
    #   cols [0 : T+1]    -> taus  = [0, cumsum(q_probs)]
    #   cols [T+1 : 2T+1] -> taus_ = sum_{i<j} q_i + q_j / 2
    packed = jnp.dot(q_probs, p_ref[...], preferred_element_type=jnp.float32)

    taus_ref[...] = packed[:, : t + 1]
    taus_mid_ref[...] = packed[:, t + 1 : 2 * t + 1]
    ent_ref[...] = -jnp.sum(q * q_probs, axis=1, keepdims=True)


@functools.partial(jax.jit, static_argnames=("block_b",))
def fpn_forward(x, w, b, *, block_b=2048):
    """Returns (taus (B, T+1), taus_ (B, T), entropy (B, 1)) like the torch FPN."""
    B, D = x.shape
    T = w.shape[1]

    # keep bf16 activations as-is (halves the x HBM read); otherwise f32
    compute_dtype = jnp.bfloat16 if x.dtype == jnp.bfloat16 else jnp.float32
    x = x.astype(compute_dtype)
    w = w.astype(compute_dtype)
    b2 = b.astype(jnp.float32).reshape(1, T)

    # batch block: large enough to amortize per-step overhead, no wrapper pad;
    # Pallas masks the ragged tail block (rows are independent).
    bb = min(_round_up(B, 8), block_b)
    # ensure >= 2 grid steps for larger batches so v7x's two TensorCores both work
    if B > 1024 and (B + bb - 1) // bb < 2:
        bb = _round_up((B + 1) // 2, 8)
    grid = (pl.cdiv(B, bb),)

    # compile-time constant pack matrix P (T, 2T+1): q_probs @ P -> [taus | taus_]
    p = np.zeros((T, 2 * T + 1), np.float32)
    for j in range(1, T + 1):
        p[:j, j] = 1.0                   # taus[:, j]  = sum_{i<j} q_i (col 0 stays 0)
    for j in range(T):
        p[:j, T + 1 + j] = 1.0           # taus_[:, j] = sum_{i<j} q_i + q_j / 2
        p[j, T + 1 + j] = 0.5
    p = jnp.asarray(p)

    taus, taus_mid, entropy = pl.pallas_call(
        fpn_kernel,
        out_shape=(
            jax.ShapeDtypeStruct((B, T + 1), jnp.float32),
            jax.ShapeDtypeStruct((B, T), jnp.float32),
            jax.ShapeDtypeStruct((B, 1), jnp.float32),
        ),
        grid=grid,
        in_specs=[
            pl.BlockSpec((bb, D), lambda i: (i, 0)),
            pl.BlockSpec((D, T), lambda i: (0, 0)),
            pl.BlockSpec((1, T), lambda i: (0, 0)),
            pl.BlockSpec((T, 2 * T + 1), lambda i: (0, 0)),
        ],
        out_specs=(
            pl.BlockSpec((bb, T + 1), lambda i: (i, 0)),
            pl.BlockSpec((bb, T), lambda i: (i, 0)),
            pl.BlockSpec((bb, 1), lambda i: (i, 0)),
        ),
        compiler_params=pltpu.CompilerParams(
            dimension_semantics=("parallel",)),
    )(x, w, b2, p)
    return taus, taus_mid, entropy


def _reference(x, w, b):
    logits = x.astype(jnp.float32) @ w + b[None, :]
    q = jax.nn.log_softmax(logits, axis=1)
    q_probs = jnp.exp(q)
    cums = jnp.cumsum(q_probs, axis=1)
    taus = jnp.concatenate([jnp.zeros((x.shape[0], 1), jnp.float32), cums], axis=1)
    taus_ = (taus[:, :-1] + taus[:, 1:]) / 2.0
    entropy = -jnp.sum(q * q_probs, axis=-1, keepdims=True)
    return taus, taus_, entropy


if __name__ == "__main__":
    layer_size = 32   # hidden size fed into the FPN
    num_tau = 8
    batch = 2

    key = jax.random.PRNGKey(0)
    kx, kw, kb = jax.random.split(key, 3)

    # deterministic parameter init matching nn.Linear(layer_size, num_tau)
    # xavier_uniform_(gain=0.01) for weight, default uniform(+-1/sqrt(fan_in)) for bias
    gain = 0.01
    xav_limit = gain * float(np.sqrt(6.0 / (layer_size + num_tau)))
    w = jax.random.uniform(kw, (layer_size, num_tau), jnp.float32,
                           minval=-xav_limit, maxval=xav_limit)
    b_limit = 1.0 / float(np.sqrt(layer_size))
    b = jax.random.uniform(kb, (num_tau,), jnp.float32,
                           minval=-b_limit, maxval=b_limit)

    x = jax.random.normal(kx, (batch, layer_size), jnp.float32)

    taus, taus_, entropy = fpn_forward(x, w, b)
    jax.block_until_ready((taus, taus_, entropy))

    # quick correctness check vs pure-JAX reference
    r_taus, r_taus_, r_ent = _reference(x, w, b)
    assert taus.shape == (batch, num_tau + 1)
    assert taus_.shape == (batch, num_tau)
    assert entropy.shape == (batch, 1)
    assert jnp.allclose(taus, r_taus, atol=1e-5)
    assert jnp.allclose(taus_, r_taus_, atol=1e-5)
    assert jnp.allclose(entropy, r_ent, atol=1e-5)

    print("KERNEL_OK")
</pallas_src>

<mosaic_0001>
module attributes {stable_mosaic.version = 11 : i64} {
  func.func @fpn_kernel(%arg0: i32, %arg1: memref<8x32xf32, #tpu.memory_space<vmem>>, %arg2: memref<32x8xf32, #tpu.memory_space<vmem>>, %arg3: memref<1x8xf32, #tpu.memory_space<vmem>>, %arg4: memref<8x17xf32, #tpu.memory_space<vmem>>, %arg5: memref<8x9xf32, #tpu.memory_space<vmem>>, %arg6: memref<8x8xf32, #tpu.memory_space<vmem>>, %arg7: memref<8x1xf32, #tpu.memory_space<vmem>>) attributes {dimension_semantics = [#tpu.dimension_semantics<parallel>], iteration_bounds = array<i64: 1>, scalar_prefetch = 0 : i64, scratch_operands = 0 : i64, tpu.core_type = #tpu.core_type<tc>, window_params = [{transform_indices = @transform_0, window_bounds = array<i64: 8, 32>}, {pipeline_mode = #tpu.pipeline_mode<synchronous>, transform_indices = @transform_1, window_bounds = array<i64: 32, 8>}, {pipeline_mode = #tpu.pipeline_mode<synchronous>, transform_indices = @transform_2, window_bounds = array<i64: 1, 8>}, {pipeline_mode = #tpu.pipeline_mode<synchronous>, transform_indices = @transform_3, window_bounds = array<i64: 8, 17>}, {transform_indices = @transform_4, window_bounds = array<i64: 8, 9>}, {transform_indices = @transform_5, window_bounds = array<i64: 8, 8>}, {transform_indices = @transform_6, window_bounds = array<i64: 8, 1>}]} {
    %c0 = arith.constant 0 : index
    %c0_0 = arith.constant 0 : index
    %0 = vector.load %arg1[%c0, %c0_0] : memref<8x32xf32, #tpu.memory_space<vmem>>, vector<8x32xf32>
    %c0_1 = arith.constant 0 : index
    %c0_2 = arith.constant 0 : index
    %1 = vector.load %arg2[%c0_1, %c0_2] : memref<32x8xf32, #tpu.memory_space<vmem>>, vector<32x8xf32>
    %c0_3 = arith.constant 0 : index
    %c0_4 = arith.constant 0 : index
    %2 = vector.load %arg3[%c0_3, %c0_4] : memref<1x8xf32, #tpu.memory_space<vmem>>, vector<1x8xf32>
    %cst = arith.constant dense<0.000000e+00> : vector<8x8xf32>
    %3 = tpu.matmul %0, %1, %cst {dimension_numbers = #tpu.dot_dimension_numbers<[1], [0], [0], [1], [0, 0, 1, 1], [], []>} : vector<8x32xf32>, vector<32x8xf32>, vector<8x8xf32> -> vector<8x8xf32>
    %4 = vector.broadcast %2 : vector<1x8xf32> to vector<8x8xf32>
    %5 = arith.addf %3, %4 : vector<8x8xf32>
    %cst_5 = arith.constant dense<0xFF800000> : vector<8xf32>
    %6 = vector.multi_reduction <maximumf>, %5, %cst_5 [1] : vector<8x8xf32> to vector<8xf32>
    %7 = vector.shape_cast %6 : vector<8xf32> to vector<8x1xf32>
    %8 = vector.broadcast %7 : vector<8x1xf32> to vector<8x8xf32>
    %9 = arith.subf %5, %8 : vector<8x8xf32>
    %10 = math.exp %9 : vector<8x8xf32>
    %cst_6 = arith.constant dense<0.000000e+00> : vector<8xf32>
    %11 = vector.multi_reduction <add>, %10, %cst_6 [1] : vector<8x8xf32> to vector<8xf32>
    %12 = vector.shape_cast %11 : vector<8xf32> to vector<8x1xf32>
    %13 = math.log %12 : vector<8x1xf32>
    %14 = vector.broadcast %13 : vector<8x1xf32> to vector<8x8xf32>
    %15 = arith.subf %9, %14 : vector<8x8xf32>
    %16 = math.exp %15 : vector<8x8xf32>
    %c0_7 = arith.constant 0 : index
    %c0_8 = arith.constant 0 : index
    %17 = vector.load %arg4[%c0_7, %c0_8] : memref<8x17xf32, #tpu.memory_space<vmem>>, vector<8x17xf32>
    %cst_9 = arith.constant dense<0.000000e+00> : vector<8x17xf32>
    %18 = tpu.matmul %16, %17, %cst_9 {dimension_numbers = #tpu.dot_dimension_numbers<[1], [0], [0], [1], [0, 0, 1, 1], [], []>} : vector<8x8xf32>, vector<8x17xf32>, vector<8x17xf32> -> vector<8x17xf32>
    %19 = vector.extract_strided_slice %18 {offsets = [0, 0], sizes = [8, 9], strides = [1, 1]} : vector<8x17xf32> to vector<8x9xf32>
    %c0_10 = arith.constant 0 : index
    %c0_11 = arith.constant 0 : index
    %20 = vector.load %arg5[%c0_10, %c0_11] : memref<8x9xf32, #tpu.memory_space<vmem>>, vector<8x9xf32>
    tpu.vector_store %arg5[%c0_10, %c0_11], %19 {strides = array<i32>} : memref<8x9xf32, #tpu.memory_space<vmem>>, vector<8x9xf32>,
    %21 = vector.extract_strided_slice %18 {offsets = [0, 9], sizes = [8, 8], strides = [1, 1]} : vector<8x17xf32> to vector<8x8xf32>
    %c0_12 = arith.constant 0 : index
    %c0_13 = arith.constant 0 : index
    %22 = vector.load %arg6[%c0_12, %c0_13] : memref<8x8xf32, #tpu.memory_space<vmem>>, vector<8x8xf32>
    tpu.vector_store %arg6[%c0_12, %c0_13], %21 {strides = array<i32>} : memref<8x8xf32, #tpu.memory_space<vmem>>, vector<8x8xf32>,
    %23 = arith.mulf %15, %16 : vector<8x8xf32>
    %cst_14 = arith.constant dense<0.000000e+00> : vector<8xf32>
    %24 = vector.multi_reduction <add>, %23, %cst_14 [1] : vector<8x8xf32> to vector<8xf32>
    %25 = vector.shape_cast %24 : vector<8xf32> to vector<8x1xf32>
    %cst_15 = arith.constant 0.000000e+00 : f32
    %26 = vector.broadcast %cst_15 : f32 to vector<8x1xf32>
    %27 = arith.subf %26, %25 : vector<8x1xf32>
    %c0_16 = arith.constant 0 : index
    %c0_17 = arith.constant 0 : index
    %28 = vector.load %arg7[%c0_16, %c0_17] : memref<8x1xf32, #tpu.memory_space<vmem>>, vector<8x1xf32>
    tpu.vector_store %arg7[%c0_16, %c0_17], %27 {strides = array<i32>} : memref<8x1xf32, #tpu.memory_space<vmem>>, vector<8x1xf32>,
    return
  }
  func.func @transform_0(%arg0: i32) -> (i32, i32) {
    %c0_i32 = arith.constant 0 : i32
    %c0_i32_0 = arith.constant 0 : i32
    return %arg0, %c0_i32 : i32, i32
  }
  func.func @transform_1(%arg0: i32) -> (i32, i32) {
    %c0_i32 = arith.constant 0 : i32
    %c0_i32_0 = arith.constant 0 : i32
    %c0_i32_1 = arith.constant 0 : i32
    return %c0_i32, %c0_i32_0 : i32, i32
  }
  func.func @transform_2(%arg0: i32) -> (i32, i32) {
    %c0_i32 = arith.constant 0 : i32
    %c0_i32_0 = arith.constant 0 : i32
    %c0_i32_1 = arith.constant 0 : i32
    return %c0_i32, %c0_i32_0 : i32, i32
  }
  func.func @transform_3(%arg0: i32) -> (i32, i32) {
    %c0_i32 = arith.constant 0 : i32
    %c0_i32_0 = arith.constant 0 : i32
    %c0_i32_1 = arith.constant 0 : i32
    return %c0_i32, %c0_i32_0 : i32, i32
  }
  func.func @transform_4(%arg0: i32) -> (i32, i32) {
    %c0_i32 = arith.constant 0 : i32
    %c0_i32_0 = arith.constant 0 : i32
    return %arg0, %c0_i32 : i32, i32
  }
  func.func @transform_5(%arg0: i32) -> (i32, i32) {
    %c0_i32 = arith.constant 0 : i32
    %c0_i32_0 = arith.constant 0 : i32
    return %arg0, %c0_i32 : i32, i32
  }
  func.func @transform_6(%arg0: i32) -> (i32, i32) {
    %c0_i32 = arith.constant 0 : i32
    %c0_i32_0 = arith.constant 0 : i32
    return %arg0, %c0_i32 : i32, i32
  }
}

</mosaic_0001>

<bundles_post_ra>
// kernel: fpn_forward.1
= control target key start
LH: loop header
LB: loop body
LE: loop exit
PB: predicated region body
PF: predicated region fallthrough
CT: control target
= control target key end

     0   :  { %12 = vsyncpa [#allocation3], 0  ;;  %s472_s0 = inlined_call_operand.vmem [shape: f32[2,32], index: 0, kind: input, shape index: {}]   ;;  %s473_s1 = inlined_call_operand.vmem [shape: f32[32,8], index: 1, kind: input, shape index: {}]   ;;  %s474_s2 = inlined_call_operand.vmem [shape: f32[1,8], index: 2, kind: input, shape index: {}]   ;;  %s475_s3 = inlined_call_operand.vmem [shape: f32[8,17], index: 3, kind: input, shape index: {}]   ;;  %s476_s4 = inlined_call_operand.hbm [shape: f32[2,9], index: 4, kind: output, shape index: {0}]   ;;  %s477_s5 = inlined_call_operand.hbm [shape: f32[2,8], index: 5, kind: output, shape index: {1}]   ;;  %s478_s6 = inlined_call_operand.vmem [shape: f32[2,1], index: 6, kind: output, shape index: {2}]  }
   0x1   :  { %13 = vsyncpa [#allocation5], 0  ;;  %v23_v0 = vld [vmem:[%s473_s1] sm:$0xff]  ;;  %v24_v1 = vld [vmem:[%s473_s1 + $0x8] sm:$0xff]  ;;  %v376_v2 = vmov 0.0|0.0   ;;  %vm377_vm0 = vmmov 0  }
   0x2   :  { %308 = vmatprep.subr.bf16.mxu0 %v376_v2  ;;  %v309_v3 = vpack.c.bf16 %v24_v1, %v23_v0  ;;  %v25_v4 = vld [vmem:[%s473_s1 + $0x10] sm:$0xff]  ;;  %v26_v5 = vld [vmem:[%s473_s1 + $0x18] sm:$0xff]  ;;  %v378_v6 = vmov 0.0   ;;  %v22_v8 = vld [vmem:[%s472_s0] sm:$0xff]  ;;  %vm34_vm1 = vcmask 261120   ;;  %vm108_vm2 = vcmask 64512  }
   0x3   :  { %300 = vmatprep.mubr.msk.f32.mxu0 %vm377_vm0, %v378_v6  ;;  %303 = vmatprep.subr.mxu1 %v378_v6  ;;  %v312_v7 = vpack.c.bf16 %v26_v5, %v25_v4  ;;  %v282_v9 = vld [vmem:[%s474_s2] ss:$0 sm:$0xff]  ;;  %vm209_vm3 = vcmask 7168   ;;  %vm197_vm4 = vcmask 72704   ;;  %s379_s2 = smov 119  }
   0x4   :  { %310 = vmatpush3.bf16.msra.mxu0 %v309_v3  ;;  %305 = vmatprep.mubr.msk.f32.mxu1 %vm377_vm0, %v378_v6  ;;  %v123_v19 = vld [vmem:[%s475_s3] sm:$0xff] }
   0x5   :  { %311 = vmatprep.subr.bf16.mxu0 %v376_v2  ;;  %304 = vmatpush3.msra.mxu1 %v123_v19 }
   0x8   :  { %313 = vmatpush3.bf16.msra.mxu0 %v312_v7 }
   0xb   :  { %301 = vmatmul.mubr.msk.f32.vlgmr.msra.gmra.mrb[0].mxu0 %vm34_vm1, %v22_v8 }
  0xde   :  { %v104_v10 = vpop.f32.mrb[0].mxu0 }
  0xdf   :  { %v105_v11 = vadd.f32 %v282_v9, %v104_v10  ;;  %v302_v12 = vpop.f32.mrb[1].mxu0 }
  0xe1   :  { %v109_v13 = vsel %vm108_vm2, %v105_v11, -inf }
  0xe2   :  { %110 = vmax.xlane.f32.xlu0 %v109_v13 }
 0x16f   :  { %v111_v14 = vpop.xlane.xlu0 %110 }
 0x170   :  { %v112_v15 = vsub.f32 %v105_v11, %v111_v14 }
 0x172   :  { %v113_v16 = vmul.f32 1.442695, %v112_v15 }
 0x174   :  { %322 = vpow2.f32 %v113_v16 }
 0x17e   :  { %v323_v17 = vpop.eup %322 }
 0x17f   :  { %v115_v18 = vsel %vm108_vm2, %v323_v17, 0.0 }
 0x180   :  { %116 = vadd.xlane.f32.xlu0 %v115_v18 }
 0x20d   :  { %v117_v20 = vpop.xlane.xlu0 %116 }
 0x20e   :  { %324 = vlog2.f32 %v117_v20 }
 0x218   :  { %v325_v21 = vpop.eup %324 }
 0x219   :  { %v119_v22 = vmul.f32 0.6931472, %v325_v21 }
 0x21b   :  { %v120_v23 = vsub.f32 %v112_v15, %v119_v22 }
 0x21d   :  { %v121_v24 = vmul.f32 1.442695, %v120_v23 }
 0x21f   :  { %326 = vpow2.f32 %v121_v24 }
 0x229   :  { %v327_v25 = vpop.eup %326 }
 0x22a   :  { %306 = vmatmul.mubr.msk.f32.vlgmr.msra.gmra.mrb[0].mxu1 %vm108_vm2, %v327_v25  ;;  %v204_v26 = vmul.f32 %v327_v25, %v120_v23 }
 0x22c   :  { %v205_v27 = vsel %vm108_vm2, %v204_v26, 0.0 }
 0x22d   :  { %206 = vadd.xlane.f32.xlu1 %v205_v27 }
 0x2ba   :  { %v207_v28 = vpop.xlane.xlu1 %206 }
 0x2bb   :  { %v208_v29 = vsub.f32 0.0, %v207_v28 }
 0x2bd   :  { %210 = vst.msk [vmem:[#allocation6] sm:$0xff] %vm209_vm3, %v208_v29 }
 0x2fd   :  { %v193_v30 = vpop.f32.mrb[0].mxu1 }
 0x2fe   :  { %198 = vst.msk [vmem:[#allocation2] sm:$0xff] %vm197_vm4, %v193_v30  ;;  %200 = vrot.lane.b32.xlu1 %v193_v30, %s379_s2  ;;  %v307_v31 = vpop.f32.mrb[1].mxu1 }
 0x370   :  { %v201_v32 = vpop.permute.xlu1 %200 }
 0x371   :  { %203 = vst.msk [vmem:[#allocation4] sm:$0xff] %vm108_vm2, %v201_v32 }
 0x372   :  { %215 = vsyncadd [#allocation3], 96  ;;  %s380_s3 = smov [#allocation2]  }
 0x373   :  { %s216_s9 = sshll.u32 %s380_s3, 4  ;;  %s217_s9 = int_to_ptr.vmem [resolvable:$true] %s216_s9 }
 0x374   :  { %s328_s10 = scalar_lea.vmem %s217_s9, 32  ;;  %s332_s11 = scalar_lea.vmem %s217_s9, 128 }
 0x375   :  { %p329_p0 = scmp.ne.s32.totalorder %s217_s9, %s328_s10  ;;  %p333_p1 = scmp.lt.s32.totalorder %s217_s9, %s217_s9 }
 0x376   :  { %p334_p2 = scmp.lt.s32.totalorder %s332_s11, %s328_s10 }
 0x378   :  { %p335_p3 = por %p334_p2, %p333_p1 }
 0x37a   :  { %p336_p4 = pnand %p335_p3, %p329_p0 }
 0x37c   :  { %339 = shalt.err (!%p336_p4)
}
 0x37d   :  { %s340_s14 = scalar_lea.hbm %s476_s4, 32 }
 0x37e   :  { %p341_p5 = scmp.ne.s32.totalorder %s476_s4, %s340_s14  ;;  %p344_p6 = scmp.lt.u32.totalorder %s340_s14, %s476_s4 }
 0x380   :  { %p346_p7 = pnand %p344_p6, %p341_p5 }
 0x382   :  { %349 = shalt.err (!%p346_p7)
}
 0x383   :  { %s381_s19 = smov 32   ;;  %s382_s20 = smov 2  }
 0x384   :  { %222 = dma.vmem_to_hbm [thread:$0]  %s217_s9, 32, %s476_s4, [#allocation3], %s381_s19, %s381_s19, %s382_s20  }
 0x385   :  { %227 = vsyncadd [#allocation5], 96  ;;  %v252_v33 = vld [vmem:[#allocation6] sm:$0x3]  ;;  %s383_s23 = smov [#allocation4]  }
 0x386   :  { %s228_s24 = sshll.u32 %s383_s23, 4  ;;  %253 = vst [vmem:[%s478_s6] sm:$0x3] %v252_v33  ;;  %s229_s24 = int_to_ptr.vmem [resolvable:$true] %s228_s24 }
 0x387   :  { %s350_s27 = scalar_lea.vmem %s229_s24, 32  ;;  %s354_s28 = scalar_lea.vmem %s229_s24, 128 }
 0x388   :  { %p351_p8 = scmp.ne.s32.totalorder %s229_s24, %s350_s27  ;;  %p355_p9 = scmp.lt.s32.totalorder %s229_s24, %s229_s24 }
 0x389   :  { %p356_p10 = scmp.lt.s32.totalorder %s354_s28, %s350_s27 }
 0x38b   :  { %p357_p11 = por %p356_p10, %p355_p9 }
 0x38d   :  { %p358_p12 = pnand %p357_p11, %p351_p8 }
 0x38f   :  { %361 = shalt.err (!%p358_p12)
}
 0x390   :  { %s362_s4 = scalar_lea.hbm %s477_s5, 32 }
 0x391   :  { %p363_p13 = scmp.ne.s32.totalorder %s477_s5, %s362_s4  ;;  %p366_p0 = scmp.lt.u32.totalorder %s362_s4, %s477_s5 }
 0x393   :  { %p368_p1 = pnand %p366_p0, %p363_p13 }
 0x395   :  { %371 = shalt.err (!%p368_p1)
}
 0x396   :  { %234 = dma.vmem_to_hbm [thread:$0]  %s229_s24, 32, %s477_s5, [#allocation5], %s381_s19, %s381_s19, %s382_s20  }
 0x397   :  { %372 = dma.done.wait [#allocation3], 128  }
 0x398   :  { %373 = vsyncadd [#allocation3], 4294967168 }
 0x399   :  { %374 = dma.done.wait [#allocation5], 128  }
 0x39a   :  { %375 = vsyncadd [#allocation5], 4294967168 }
 0x39b   :  { %276 = vsyncpa [#allocation3], 1 }
 0x39c   :  { %277 = vsyncpa [#allocation5], 1 }

</bundles_post_ra>
